<compile_context>
chip_gen: v7x
topology: tpu7x:2x2x1
jax: 0.10.0
libtpu: 0.0.40
codegen_flags: <defaults>
</compile_context>

<pallas_src>
import functools

import jax
import jax.numpy as jnp
from jax.experimental import pallas as pl
from jax.experimental.pallas import tpu as pltpu


# ----------------------------- Pallas kernel ------------------------------- #

def _fused_mha_kernel(x_ref, wq_ref, bq_ref, wk_ref, bk_ref,
                      wv_ref, bv_ref, wo_ref, bo_ref, o_ref):
    """One batch element per grid step: per-head proj -> MHA -> out_proj + residual."""
    H, E, Dh = wq_ref.shape
    L = x_ref.shape[0]

    x = x_ref[...]                                         # (L, E) f32 (exact residual)
    # Broadcast x over the head axis so every contraction below is a plain
    # leading-batch 3-D x 3-D dot_general (no head repack, no transposes).
    xh = jnp.broadcast_to(x.astype(jnp.bfloat16)[None, :, :], (H, L, E))

    # Per-head fused projections (wq/wk/wv composed with the matching
    # in_proj slices host-side); bf16 MXU operands, f32 accumulation,
    # f32 bias add. The q path already carries the 1/sqrt(Dh) scaling.
    def proj(w_ref, b_ref):
        return jnp.einsum('hle,hed->hld', xh, w_ref[...],
                          preferred_element_type=jnp.float32) + b_ref[...]

    q = proj(wq_ref, bq_ref)                               # (H, L, Dh)
    k = proj(wk_ref, bk_ref)                               # (H, L, Dh)
    v = proj(wv_ref, bv_ref)                               # (H, L, Dh)

    # Per-head scores; softmax stats stay in f32 (no mask needed).
    s = jnp.einsum('hqd,hkd->hqk',
                   q.astype(jnp.bfloat16), k.astype(jnp.bfloat16),
                   preferred_element_type=jnp.float32)     # (H, L, L)
    m = jnp.max(s, axis=-1, keepdims=True)
    p = jnp.exp(s - m)
    # NOTE: approx reciprocal (EUP slot) has ~2^-12 relative error in the
    # softmax normalization; well within this module's tolerance.
    p = p * pl.reciprocal(jnp.sum(p, axis=-1, keepdims=True), approx=True)

    ctx = jnp.einsum('hqk,hkd->hqd',
                     p.astype(jnp.bfloat16), v.astype(jnp.bfloat16),
                     preferred_element_type=jnp.float32)   # (H, L, Dh)

    # Batched per-head out-projection, then head-sum + bias + residual (f32).
    # TODO(synk): at production scale, repack ctx to (L, E) once and use a
    # single K=E contraction for better MXU depth utilization.
    outh = jnp.einsum('hqd,hde->hqe',
                      ctx.astype(jnp.bfloat16), wo_ref[...],
                      preferred_element_type=jnp.float32)  # (H, L, E)
    o_ref[...] = (x + bo_ref[...] + jnp.sum(outh, axis=0)).astype(o_ref.dtype)


# ------------------------------- Wrapper ----------------------------------- #

def prepare_params(params, dim, num_heads):
    """One-time host-side folding of static weights into kernel-friendly form."""
    E, H = dim, num_heads
    Dh = E // H
    assert H * Dh == E
    scale = 1.0 / float(Dh) ** 0.5

    w_in = params['in_proj_w']          # (3E, E)  (out, in)
    b_in = params['in_proj_b']          # (1, 3E)

    def fold(w, b, w_slice, b_slice, s=1.0):
        # (x @ w.T + b) @ w_slice.T + b_slice == x @ W_eff + b_eff
        w_eff = (w_slice @ w).T * s                       # (E_in, E_out), pre-transposed
        b_eff = (b @ w_slice.T + b_slice) * s             # (1, E_out)
        # Head-major weights for the batched kernel einsums.
        w3 = jnp.transpose(w_eff.reshape(E, H, Dh), (1, 0, 2))   # (H, E, Dh)
        b3 = jnp.transpose(b_eff.reshape(1, H, Dh), (1, 0, 2))   # (H, 1, Dh)
        return w3.astype(jnp.bfloat16), b3.astype(jnp.float32)

    wq, bq = fold(params['wq_w'], params['wq_b'], w_in[:E], b_in[:, :E], scale)
    wk, bk = fold(params['wk_w'], params['wk_b'], w_in[E:2 * E], b_in[:, E:2 * E])
    wv, bv = fold(params['wv_w'], params['wv_b'], w_in[2 * E:], b_in[:, 2 * E:])

    # out_proj: (out, in) -> pre-transposed (ctx_feature, out) -> (H, Dh, E)
    wo = jnp.transpose(params['out_proj_w']).reshape(H, Dh, E).astype(jnp.bfloat16)
    bo = params['out_proj_b'].astype(jnp.float32)         # (1, E)

    return {'wq': wq, 'bq': bq, 'wk': wk, 'bk': bk,
            'wv': wv, 'bv': bv, 'wo': wo, 'bo': bo}


@jax.jit
def attention_forward(x, prep):
    L, N, E = x.shape
    H, _, Dh = prep['wq'].shape

    # Batch-major view so each grid step's block has (L, E) as its last two
    # dims (full-dim, (8,128)-compliant tiling). The module's (L, N, E)
    # convention puts batch on the second-minor axis, where a per-batch block
    # (size 1 < 8, != N) would violate the TPU block constraint.
    # TODO(synk): at production sizes keep activations batch-major end-to-end
    # (or fuse this transpose into the producer) so x/y avoid this HBM pass.
    xb = jnp.transpose(x, (1, 0, 2))                       # (N, L, E)

    def const3(shape):
        # Constant-index (replicated) weight blocks; never re-fetched per step.
        # TODO(synk): on v7x (64 MiB VMEM) mark these pipeline_mode=Buffered(1)
        # at production sizes so replicated weights aren't double-buffered.
        return pl.BlockSpec(shape, lambda n: (0, 0, 0))

    yb = pl.pallas_call(
        _fused_mha_kernel,
        out_shape=jax.ShapeDtypeStruct((N, L, E), x.dtype),
        grid=(N,),
        in_specs=[
            pl.BlockSpec((None, L, E), lambda n: (n, 0, 0)),   # x: one batch / step
            const3((H, E, Dh)), const3((H, 1, Dh)),            # folded q (scale folded in)
            const3((H, E, Dh)), const3((H, 1, Dh)),            # folded k
            const3((H, E, Dh)), const3((H, 1, Dh)),            # folded v
            const3((H, Dh, E)),                                # out_proj weight
            pl.BlockSpec((1, E), lambda n: (0, 0)),            # out_proj bias
        ],
        out_specs=pl.BlockSpec((None, L, E), lambda n: (n, 0, 0)),
        compiler_params=pltpu.CompilerParams(
            dimension_semantics=("parallel",),
            vmem_limit_bytes=32 * 1024 * 1024),
    )(xb, prep['wq'], prep['bq'], prep['wk'], prep['bk'],
      prep['wv'], prep['bv'], prep['wo'], prep['bo'])

    # TODO(synk): for production L, tile queries over a second (parallel) grid
    # axis and stream K/V tiles with an online (flash) softmax accumulator in
    # VMEM scratch instead of materializing (H, L, L); at production E >= 128
    # this out_spec is already lane-dense (here E=32 -> masked stores, toy size).
    return jnp.transpose(yb, (1, 0, 2))                    # back to (L, N, E)


# --------------------- Deterministic parameter init ------------------------ #

def init_params(key, dim):
    ks = jax.random.split(key, 10)
    s = 1.0 / jnp.sqrt(dim)

    def w(k, shape):
        return jax.random.uniform(k, shape, jnp.float32, -s, s)

    return {
        'wq_w': w(ks[0], (dim, dim)),       'wq_b': w(ks[1], (1, dim)),
        'wk_w': w(ks[2], (dim, dim)),       'wk_b': w(ks[3], (1, dim)),
        'wv_w': w(ks[4], (dim, dim)),       'wv_b': w(ks[5], (1, dim)),
        'in_proj_w': w(ks[6], (3 * dim, dim)),
        'in_proj_b': w(ks[7], (1, 3 * dim)),
        'out_proj_w': w(ks[8], (dim, dim)),
        'out_proj_b': w(ks[9], (1, dim)),
    }


# ------------------------- Pure-JAX reference ------------------------------ #

def reference(x, params, num_heads):
    L, N, E = x.shape
    H = num_heads
    Dh = E // H
    xf = x.reshape(L * N, E)
    q = xf @ params['wq_w'].T + params['wq_b']
    k = xf @ params['wk_w'].T + params['wk_b']
    v = xf @ params['wv_w'].T + params['wv_b']
    w, b = params['in_proj_w'], params['in_proj_b']
    qp = q @ w[:E].T + b[:, :E]
    kp = k @ w[E:2 * E].T + b[:, E:2 * E]
    vp = v @ w[2 * E:].T + b[:, 2 * E:]

    def th(t):
        return t.reshape(L, N, H, Dh).transpose(1, 2, 0, 3).reshape(N * H, L, Dh)

    qh, kh, vh = th(qp), th(kp), th(vp)
    s = jnp.einsum('bld,bmd->blm', qh, kh) / jnp.sqrt(jnp.float32(Dh))
    p = jax.nn.softmax(s, axis=-1)
    ctx = jnp.einsum('blm,bmd->bld', p, vh)
    cf = ctx.reshape(N, H, L, Dh).transpose(2, 0, 1, 3).reshape(L * N, E)
    out = cf @ params['out_proj_w'].T + params['out_proj_b']
    return (out + xf).reshape(L, N, E)


# --------------------------------- Main ------------------------------------ #

if __name__ == "__main__":
    dim, num_heads = 32, 4       # embed_dim=32, 4 heads -> head_dim=8
    L, N = 8, 2                  # seq_len=8, batch=2

    key = jax.random.PRNGKey(0)
    kx, kp = jax.random.split(key)
    x = jax.random.normal(kx, (L, N, dim), jnp.float32)
    params = init_params(kp, dim)
    prep = prepare_params(params, dim, num_heads)

    y = attention_forward(x, prep)
    y = jax.block_until_ready(y)

    ref = reference(x, params, num_heads)
    assert y.shape == (L, N, dim)
    err = float(jnp.max(jnp.abs(y - ref)))
    # Tolerance covers intentional bf16 MXU operands + approx softmax reciprocal.
    assert jnp.allclose(y, ref, atol=5e-3, rtol=5e-3), err

    print("KERNEL_OK")
</pallas_src>

<mosaic_0001>
module attributes {stable_mosaic.version = 11 : i64} {
  func.func @_fused_mha_kernel(%arg0: i32, %arg1: memref<1x8x32xf32, #tpu.memory_space<vmem>>, %arg2: memref<4x32x8xbf16, #tpu.memory_space<vmem>>, %arg3: memref<4x1x8xf32, #tpu.memory_space<vmem>>, %arg4: memref<4x32x8xbf16, #tpu.memory_space<vmem>>, %arg5: memref<4x1x8xf32, #tpu.memory_space<vmem>>, %arg6: memref<4x32x8xbf16, #tpu.memory_space<vmem>>, %arg7: memref<4x1x8xf32, #tpu.memory_space<vmem>>, %arg8: memref<4x8x32xbf16, #tpu.memory_space<vmem>>, %arg9: memref<1x32xf32, #tpu.memory_space<vmem>>, %arg10: memref<1x8x32xf32, #tpu.memory_space<vmem>>) attributes {dimension_semantics = [#tpu.dimension_semantics<parallel>], iteration_bounds = array<i64: 2>, scalar_prefetch = 0 : i64, scratch_operands = 0 : i64, tpu.core_type = #tpu.core_type<tc>, window_params = [{transform_indices = @transform_0, window_bounds = array<i64: 1, 8, 32>}, {pipeline_mode = #tpu.pipeline_mode<synchronous>, transform_indices = @transform_1, window_bounds = array<i64: 4, 32, 8>}, {pipeline_mode = #tpu.pipeline_mode<synchronous>, transform_indices = @transform_2, window_bounds = array<i64: 4, 1, 8>}, {pipeline_mode = #tpu.pipeline_mode<synchronous>, transform_indices = @transform_3, window_bounds = array<i64: 4, 32, 8>}, {pipeline_mode = #tpu.pipeline_mode<synchronous>, transform_indices = @transform_4, window_bounds = array<i64: 4, 1, 8>}, {pipeline_mode = #tpu.pipeline_mode<synchronous>, transform_indices = @transform_5, window_bounds = array<i64: 4, 32, 8>}, {pipeline_mode = #tpu.pipeline_mode<synchronous>, transform_indices = @transform_6, window_bounds = array<i64: 4, 1, 8>}, {pipeline_mode = #tpu.pipeline_mode<synchronous>, transform_indices = @transform_7, window_bounds = array<i64: 4, 8, 32>}, {pipeline_mode = #tpu.pipeline_mode<synchronous>, transform_indices = @transform_8, window_bounds = array<i64: 1, 32>}, {transform_indices = @transform_9, window_bounds = array<i64: 1, 8, 32>}]} {
    %c0 = arith.constant 0 : index
    %c0_0 = arith.constant 0 : index
    %c0_1 = arith.constant 0 : index
    %0 = vector.load %arg1[%c0, %c0_0, %c0_1] : memref<1x8x32xf32, #tpu.memory_space<vmem>>, vector<1x8x32xf32>
    %1 = vector.shape_cast %0 : vector<1x8x32xf32> to vector<8x32xf32>
    %2 = arith.truncf %1 : vector<8x32xf32> to vector<8x32xbf16>
    %3 = vector.shape_cast %2 : vector<8x32xbf16> to vector<1x8x32xbf16>
    %4 = vector.shape_cast %3 : vector<1x8x32xbf16> to vector<1x8x32xbf16>
    %5 = vector.broadcast %4 : vector<1x8x32xbf16> to vector<4x8x32xbf16>
    %c0_2 = arith.constant 0 : index
    %c0_3 = arith.constant 0 : index
    %c0_4 = arith.constant 0 : index
    %6 = vector.load %arg2[%c0_2, %c0_3, %c0_4] : memref<4x32x8xbf16, #tpu.memory_space<vmem>>, vector<4x32x8xbf16>
    "tpu.trace_start"() <{level = 10 : i32, message = "hle,hed->hld"}> : () -> ()
    %cst = arith.constant dense<0.000000e+00> : vector<4x8x8xf32>
    %7 = tpu.matmul %5, %6, %cst {dimension_numbers = #tpu.dot_dimension_numbers<[2], [1], [1], [2], [0, 0, 0, 1, 1, 2], [0], [0]>} : vector<4x8x32xbf16>, vector<4x32x8xbf16>, vector<4x8x8xf32> -> vector<4x8x8xf32>
    "tpu.trace_stop"() : () -> ()
    %c0_5 = arith.constant 0 : index
    %c0_6 = arith.constant 0 : index
    %c0_7 = arith.constant 0 : index
    %8 = vector.load %arg3[%c0_5, %c0_6, %c0_7] : memref<4x1x8xf32, #tpu.memory_space<vmem>>, vector<4x1x8xf32>
    %9 = vector.broadcast %8 : vector<4x1x8xf32> to vector<4x8x8xf32>
    %10 = arith.addf %7, %9 : vector<4x8x8xf32>
    %c0_8 = arith.constant 0 : index
    %c0_9 = arith.constant 0 : index
    %c0_10 = arith.constant 0 : index
    %11 = vector.load %arg4[%c0_8, %c0_9, %c0_10] : memref<4x32x8xbf16, #tpu.memory_space<vmem>>, vector<4x32x8xbf16>
    "tpu.trace_start"() <{level = 10 : i32, message = "hle,hed->hld"}> : () -> ()
    %cst_11 = arith.constant dense<0.000000e+00> : vector<4x8x8xf32>
    %12 = tpu.matmul %5, %11, %cst_11 {dimension_numbers = #tpu.dot_dimension_numbers<[2], [1], [1], [2], [0, 0, 0, 1, 1, 2], [0], [0]>} : vector<4x8x32xbf16>, vector<4x32x8xbf16>, vector<4x8x8xf32> -> vector<4x8x8xf32>
    "tpu.trace_stop"() : () -> ()
    %c0_12 = arith.constant 0 : index
    %c0_13 = arith.constant 0 : index
    %c0_14 = arith.constant 0 : index
    %13 = vector.load %arg5[%c0_12, %c0_13, %c0_14] : memref<4x1x8xf32, #tpu.memory_space<vmem>>, vector<4x1x8xf32>
    %14 = vector.broadcast %13 : vector<4x1x8xf32> to vector<4x8x8xf32>
    %15 = arith.addf %12, %14 : vector<4x8x8xf32>
    %c0_15 = arith.constant 0 : index
    %c0_16 = arith.constant 0 : index
    %c0_17 = arith.constant 0 : index
    %16 = vector.load %arg6[%c0_15, %c0_16, %c0_17] : memref<4x32x8xbf16, #tpu.memory_space<vmem>>, vector<4x32x8xbf16>
    "tpu.trace_start"() <{level = 10 : i32, message = "hle,hed->hld"}> : () -> ()
    %cst_18 = arith.constant dense<0.000000e+00> : vector<4x8x8xf32>
    %17 = tpu.matmul %5, %16, %cst_18 {dimension_numbers = #tpu.dot_dimension_numbers<[2], [1], [1], [2], [0, 0, 0, 1, 1, 2], [0], [0]>} : vector<4x8x32xbf16>, vector<4x32x8xbf16>, vector<4x8x8xf32> -> vector<4x8x8xf32>
    "tpu.trace_stop"() : () -> ()
    %c0_19 = arith.constant 0 : index
    %c0_20 = arith.constant 0 : index
    %c0_21 = arith.constant 0 : index
    %18 = vector.load %arg7[%c0_19, %c0_20, %c0_21] : memref<4x1x8xf32, #tpu.memory_space<vmem>>, vector<4x1x8xf32>
    %19 = vector.broadcast %18 : vector<4x1x8xf32> to vector<4x8x8xf32>
    %20 = arith.addf %17, %19 : vector<4x8x8xf32>
    %21 = arith.truncf %10 : vector<4x8x8xf32> to vector<4x8x8xbf16>
    %22 = arith.truncf %15 : vector<4x8x8xf32> to vector<4x8x8xbf16>
    "tpu.trace_start"() <{level = 10 : i32, message = "hqd,hkd->hqk"}> : () -> ()
    %cst_22 = arith.constant dense<0.000000e+00> : vector<4x8x8xf32>
    %23 = tpu.matmul %21, %22, %cst_22 {dimension_numbers = #tpu.dot_dimension_numbers<[2], [2], [1], [1], [0, 0, 0, 1, 1, 1], [0], [0]>} : vector<4x8x8xbf16>, vector<4x8x8xbf16>, vector<4x8x8xf32> -> vector<4x8x8xf32>
    "tpu.trace_stop"() : () -> ()
    %cst_23 = arith.constant dense<0xFF800000> : vector<4x8xf32>
    %24 = vector.multi_reduction <maximumf>, %23, %cst_23 [2] : vector<4x8x8xf32> to vector<4x8xf32>
    %25 = vector.shape_cast %24 : vector<4x8xf32> to vector<4x8x1xf32>
    %26 = vector.broadcast %25 : vector<4x8x1xf32> to vector<4x8x8xf32>
    %27 = arith.subf %23, %26 : vector<4x8x8xf32>
    %28 = math.exp %27 : vector<4x8x8xf32>
    %cst_24 = arith.constant dense<0.000000e+00> : vector<4x8xf32>
    %29 = vector.multi_reduction <add>, %28, %cst_24 [2] : vector<4x8x8xf32> to vector<4x8xf32>
    %30 = vector.shape_cast %29 : vector<4x8xf32> to vector<4x8x1xf32>
    %31 = tpu.reciprocal %30 {approx = true} : vector<4x8x1xf32> -> vector<4x8x1xf32>
    %32 = vector.broadcast %31 : vector<4x8x1xf32> to vector<4x8x8xf32>
    %33 = arith.mulf %28, %32 : vector<4x8x8xf32>
    %34 = arith.truncf %33 : vector<4x8x8xf32> to vector<4x8x8xbf16>
    %35 = arith.truncf %20 : vector<4x8x8xf32> to vector<4x8x8xbf16>
    "tpu.trace_start"() <{level = 10 : i32, message = "hqk,hkd->hqd"}> : () -> ()
    %cst_25 = arith.constant dense<0.000000e+00> : vector<4x8x8xf32>
    %36 = tpu.matmul %34, %35, %cst_25 {dimension_numbers = #tpu.dot_dimension_numbers<[2], [1], [1], [2], [0, 0, 0, 1, 1, 2], [0], [0]>} : vector<4x8x8xbf16>, vector<4x8x8xbf16>, vector<4x8x8xf32> -> vector<4x8x8xf32>
    "tpu.trace_stop"() : () -> ()
    %37 = arith.truncf %36 : vector<4x8x8xf32> to vector<4x8x8xbf16>
    %c0_26 = arith.constant 0 : index
    %c0_27 = arith.constant 0 : index
    %c0_28 = arith.constant 0 : index
    %38 = vector.load %arg8[%c0_26, %c0_27, %c0_28] : memref<4x8x32xbf16, #tpu.memory_space<vmem>>, vector<4x8x32xbf16>
    "tpu.trace_start"() <{level = 10 : i32, message = "hqd,hde->hqe"}> : () -> ()
    %cst_29 = arith.constant dense<0.000000e+00> : vector<4x8x32xf32>
    %39 = tpu.matmul %37, %38, %cst_29 {dimension_numbers = #tpu.dot_dimension_numbers<[2], [1], [1], [2], [0, 0, 0, 1, 1, 2], [0], [0]>} : vector<4x8x8xbf16>, vector<4x8x32xbf16>, vector<4x8x32xf32> -> vector<4x8x32xf32>
    "tpu.trace_stop"() : () -> ()
    %c0_30 = arith.constant 0 : index
    %c0_31 = arith.constant 0 : index
    %40 = vector.load %arg9[%c0_30, %c0_31] : memref<1x32xf32, #tpu.memory_space<vmem>>, vector<1x32xf32>
    %41 = vector.broadcast %40 : vector<1x32xf32> to vector<8x32xf32>
    %42 = arith.addf %1, %41 : vector<8x32xf32>
    %cst_32 = arith.constant dense<0.000000e+00> : vector<8x32xf32>
    %43 = vector.multi_reduction <add>, %39, %cst_32 [0] : vector<4x8x32xf32> to vector<8x32xf32>
    %44 = arith.addf %42, %43 : vector<8x32xf32>
    %c0_33 = arith.constant 0 : index
    %c0_34 = arith.constant 0 : index
    %c0_35 = arith.constant 0 : index
    %45 = vector.load %arg10[%c0_33, %c0_34, %c0_35] : memref<1x8x32xf32, #tpu.memory_space<vmem>>, vector<1x8x32xf32>
    %46 = vector.shape_cast %45 : vector<1x8x32xf32> to vector<8x32xf32>
    %47 = vector.shape_cast %44 : vector<8x32xf32> to vector<1x8x32xf32>
    tpu.vector_store %arg10[%c0_33, %c0_34, %c0_35], %47 {strides = array<i32>} : memref<1x8x32xf32, #tpu.memory_space<vmem>>, vector<1x8x32xf32>,
    return
  }
  func.func @transform_0(%arg0: i32) -> (i32, i32, i32) {
    %c0_i32 = arith.constant 0 : i32
    %c0_i32_0 = arith.constant 0 : i32
    %c0_i32_1 = arith.constant 0 : i32
    return %arg0, %c0_i32, %c0_i32_0 : i32, i32, i32
  }
  func.func @transform_1(%arg0: i32) -> (i32, i32, i32) {
    %c0_i32 = arith.constant 0 : i32
    %c0_i32_0 = arith.constant 0 : i32
    %c0_i32_1 = arith.constant 0 : i32
    %c0_i32_2 = arith.constant 0 : i32
    return %c0_i32, %c0_i32_0, %c0_i32_1 : i32, i32, i32
  }
  func.func @transform_2(%arg0: i32) -> (i32, i32, i32) {
    %c0_i32 = arith.constant 0 : i32
    %c0_i32_0 = arith.constant 0 : i32
    %c0_i32_1 = arith.constant 0 : i32
    %c0_i32_2 = arith.constant 0 : i32
    return %c0_i32, %c0_i32_0, %c0_i32_1 : i32, i32, i32
  }
  func.func @transform_3(%arg0: i32) -> (i32, i32, i32) {
    %c0_i32 = arith.constant 0 : i32
    %c0_i32_0 = arith.constant 0 : i32
    %c0_i32_1 = arith.constant 0 : i32
    %c0_i32_2 = arith.constant 0 : i32
    return %c0_i32, %c0_i32_0, %c0_i32_1 : i32, i32, i32
  }
  func.func @transform_4(%arg0: i32) -> (i32, i32, i32) {
    %c0_i32 = arith.constant 0 : i32
    %c0_i32_0 = arith.constant 0 : i32
    %c0_i32_1 = arith.constant 0 : i32
    %c0_i32_2 = arith.constant 0 : i32
    return %c0_i32, %c0_i32_0, %c0_i32_1 : i32, i32, i32
  }
  func.func @transform_5(%arg0: i32) -> (i32, i32, i32) {
    %c0_i32 = arith.constant 0 : i32
    %c0_i32_0 = arith.constant 0 : i32
    %c0_i32_1 = arith.constant 0 : i32
    %c0_i32_2 = arith.constant 0 : i32
    return %c0_i32, %c0_i32_0, %c0_i32_1 : i32, i32, i32
  }
  func.func @transform_6(%arg0: i32) -> (i32, i32, i32) {
    %c0_i32 = arith.constant 0 : i32
    %c0_i32_0 = arith.constant 0 : i32
    %c0_i32_1 = arith.constant 0 : i32
    %c0_i32_2 = arith.constant 0 : i32
    return %c0_i32, %c0_i32_0, %c0_i32_1 : i32, i32, i32
  }
  func.func @transform_7(%arg0: i32) -> (i32, i32, i32) {
    %c0_i32 = arith.constant 0 : i32
    %c0_i32_0 = arith.constant 0 : i32
    %c0_i32_1 = arith.constant 0 : i32
    %c0_i32_2 = arith.constant 0 : i32
    return %c0_i32, %c0_i32_0, %c0_i32_1 : i32, i32, i32
  }
  func.func @transform_8(%arg0: i32) -> (i32, i32) {
    %c0_i32 = arith.constant 0 : i32
    %c0_i32_0 = arith.constant 0 : i32
    %c0_i32_1 = arith.constant 0 : i32
    return %c0_i32, %c0_i32_0 : i32, i32
  }
  func.func @transform_9(%arg0: i32) -> (i32, i32, i32) {
    %c0_i32 = arith.constant 0 : i32
    %c0_i32_0 = arith.constant 0 : i32
    %c0_i32_1 = arith.constant 0 : i32
    return %arg0, %c0_i32, %c0_i32_0 : i32, i32, i32
  }
}

</mosaic_0001>

<bundles_post_ra>
// kernel: attention_forward.1
= control target key start
LH: loop header
LB: loop body
LE: loop exit
PB: predicated region body
PF: predicated region fallthrough
CT: control target
= control target key end

     0   :  { %s2191_s30 = smov 0   ;;  %s2496_s0 = inlined_call_operand.vmem [shape: f32[2,8,32], index: 0, kind: input, shape index: {}]   ;;  %s2497_s1 = inlined_call_operand.vmem [shape: bf16[4,32,8], index: 1, kind: input, shape index: {}]   ;;  %s2498_s2 = inlined_call_operand.vmem [shape: f32[4,1,8], index: 2, kind: input, shape index: {}]   ;;  %s2499_s3 = inlined_call_operand.vmem [shape: bf16[4,32,8], index: 3, kind: input, shape index: {}]   ;;  %s2500_s4 = inlined_call_operand.vmem [shape: f32[4,1,8], index: 4, kind: input, shape index: {}]   ;;  %s2501_s5 = inlined_call_operand.vmem [shape: bf16[4,32,8], index: 5, kind: input, shape index: {}]   ;;  %s2502_s6 = inlined_call_operand.vmem [shape: f32[4,1,8], index: 6, kind: input, shape index: {}]   ;;  %s2503_s7 = inlined_call_operand.vmem [shape: bf16[4,8,32], index: 7, kind: input, shape index: {}]   ;;  %s2504_s8 = inlined_call_operand.vmem [shape: f32[1,32], index: 8, kind: input, shape index: {}]   ;;  %s2505_s9 = inlined_call_operand.vmem [shape: f32[2,8,32], index: 9, kind: output, shape index: {}]  }
   0x1 LB: > { %s1783_s10 = sadd.s32 4294967295, %s2137_s30   ;;  %p1787_p0 = scmp.ge.s32.totalorder %s2137_s30, 1  ;;  %s2137_s30 = sphi %s2191_s30, %s19_s30  }
   0x2   : > { %p286_p1 = scmp.lt.s32.totalorder %s2137_s30, 3 }
   0x4   : > { %p287_p2 = pnand %p1787_p0, %p286_p1 }
   0x5   : > { %v2091_v0 = vld [vmem:[%s2497_s1] sm:$0xff] (!%p287_p2)   ;;  %v2139_v1 = vmov (!%p287_p2), 0.0   ;;  %v2092_v2 = vld [vmem:[%s2497_s1 + $0x10] sm:$0xff] (!%p287_p2)   ;;  %v2093_v3 = vld [vmem:[%s2497_s1 + $0x8] sm:$0xff] (!%p287_p2)   ;;  %vm2140_vm0 = vmmov (!%p287_p2), 0   ;;  %p320_p3 = scmp.lt.s32.totalorder (!%p287_p2), %s1783_s10, 1 }
   0x6   : > { %290 = sbr.rel (%p287_p2) target bundleno = 1231 (0x4cf), region = 56  ;;  %1913 = vmatprep.subr.bf16.mxu0 (!%p287_p2), %v2139_v1  ;;  %1921 = vmatprep.subr.bf16.mxu1 (!%p287_p2), %v2139_v1  ;;  %v2094_v4 = vld [vmem:[%s2497_s1 + $0x18] sm:$0xff] (!%p287_p2)   ;;  %v2095_v5 = vld [vmem:[%s2497_s1 + $0x20] sm:$0xff] (!%p287_p2)   ;;  %v2096_v6 = vld [vmem:[%s2497_s1 + $0x30] sm:$0xff] (!%p287_p2)   ;;  %vm387_vm1 = vcmask (!%p287_p2), 261120   ;;  %vm1099_vm2 = vcmask (!%p287_p2), 64512  }
   0x7   : > { %1914 = vmatpush3.bf16.msra.mxu0 (!%p287_p2), %v2091_v0  ;;  %1917 = vmatprep.mubr.msk.bf16.mxu0 (!%p287_p2), %vm2140_vm0, %v2139_v1  ;;  %v2097_v9 = vld [vmem:[%s2497_s1 + $0x28] sm:$0xff] (!%p287_p2)   ;;  %v2098_v10 = vld [vmem:[%s2497_s1 + $0x38] sm:$0xff] (!%p287_p2)   ;;  %v2099_v11 = vld [vmem:[%s2499_s3] sm:$0xff] (!%p287_p2)   ;;  %vm1339_vm3 = vcmask (!%p287_p2), 1043456  }
   0x8   : > { %1922 = vmatpush3.bf16.msra.mxu1 (!%p287_p2), %v2092_v2  ;;  %1915 = vmatprep.subr.bf16.mxu0 (!%p287_p2), %v2139_v1  ;;  %v2100_v12 = vld [vmem:[%s2499_s3 + $0x10] sm:$0xff] (!%p287_p2)   ;;  %v2101_v13 = vld [vmem:[%s2499_s3 + $0x8] sm:$0xff] (!%p287_p2)   ;;  %v2102_v14 = vld [vmem:[%s2499_s3 + $0x18] sm:$0xff] (!%p287_p2)  }
   0x9   : > { %1923 = vmatprep.subr.bf16.mxu1 (!%p287_p2), %v2139_v1  ;;  %1925 = vmatprep.mubr.msk.bf16.mxu1 (!%p287_p2), %vm2140_vm0, %v2139_v1  ;;  %v2103_v15 = vld [vmem:[%s2499_s3 + $0x20] sm:$0xff] (!%p287_p2)   ;;  %v2104_v16 = vld [vmem:[%s2499_s3 + $0x30] sm:$0xff] (!%p287_p2)   ;;  %v2105_v17 = vld [vmem:[%s2499_s3 + $0x28] sm:$0xff] (!%p287_p2)  }
   0xa   : > { %v2106_v18 = vld [vmem:[%s2499_s3 + $0x38] sm:$0xff] (!%p287_p2)   ;;  %v2107_v19 = vld [vmem:[%s2501_s5] sm:$0xff] (!%p287_p2)   ;;  %v2108_v20 = vld [vmem:[%s2501_s5 + $0x10] sm:$0xff] (!%p287_p2)  }
   0xb   : > { %1916 = vmatpush3.bf16.msra.mxu0 (!%p287_p2), %v2093_v3  ;;  %v2109_v21 = vld [vmem:[%s2501_s5 + $0x8] sm:$0xff] (!%p287_p2)   ;;  %v2110_v22 = vld [vmem:[%s2501_s5 + $0x18] sm:$0xff] (!%p287_p2)   ;;  %v2111_v23 = vld [vmem:[%s2501_s5 + $0x20] sm:$0xff] (!%p287_p2)  }
   0xc   : > { %1924 = vmatpush3.bf16.msra.mxu1 (!%p287_p2), %v2094_v4  ;;  %1929 = vmatprep.subr.bf16.mxu0 (!%p287_p2), %v2139_v1  ;;  %v2112_v24 = vld [vmem:[%s2501_s5 + $0x30] sm:$0xff] (!%p287_p2)   ;;  %v2113_v25 = vld [vmem:[%s2501_s5 + $0x28] sm:$0xff] (!%p287_p2)   ;;  %v2114_v26 = vld [vmem:[%s2501_s5 + $0x38] sm:$0xff] (!%p287_p2)  }
   0xd   : > { %s2507_s10 = smov (!%p320_p3, %s1783_s10), 1  ;;  %1937 = vmatprep.subr.bf16.mxu1 %v2139_v1  ;;  %v1806_v43 = vld [vmem:[%s2500_s4] ss:$0 sm:$0xff]  ;;  %v1807_v44 = vld [vmem:[%s2500_s4 + $0x1] ss:$0 sm:$0xff] }
   0xe   : > { %s1788_s19 = sshll.u32 %s2507_s10, 3  ;;  %v1790_v57 = vld [vmem:[%s2498_s2] ss:$0 sm:$0xff]  ;;  %v1791_v58 = vld [vmem:[%s2498_s2 + $0x1] ss:$0 sm:$0xff] }
   0xf   : > { %s323_s24 = scalar_lea.vmem %s2496_s0, %s1788_s19  ;;  %v1808_v61 = vld [vmem:[%s2500_s4 + $0x2] ss:$0 sm:$0xff]  ;;  %v1809_v62 = vld [vmem:[%s2500_s4 + $0x3] ss:$0 sm:$0xff]  ;;  %s327_s27 = scalar_lea.vmem %s2505_s9, %s1788_s19 }
  0x10   : > { %v2234_v7 = vld [vmem:[%s323_s24] sm:$0xff] }
  0x11   : > { %v2239_v8 = vpack.c.bf16 %v2234_v7, %v2234_v7 }
  0x13   : > { %1918 = vmatmul.mubr.msk.bf16.vlgmr.msra.gmra.mrb[0].mxu0 %vm387_vm1, %v2239_v8  ;;  %1926 = vmatmul.mubr.msk.bf16.vlgmr.msra.gmra.mrb[0].mxu1 %vm387_vm1, %v2239_v8 }
  0x14   : > { %1930 = vmatpush3.bf16.msra.mxu0 %v2095_v5  ;;  %1938 = vmatpush3.bf16.msra.mxu1 %v2096_v6 }
  0x15   : > { %1931 = vmatprep.subr.bf16.mxu0 %v2139_v1  ;;  %1939 = vmatprep.subr.bf16.mxu1 %v2139_v1 }
  0x16   : > { %1933 = vmatprep.mubr.msk.bf16.mxu0 %vm2140_vm0, %v2139_v1  ;;  %1941 = vmatprep.mubr.msk.bf16.mxu1 %vm2140_vm0, %v2139_v1 }
  0x18   : > { %1932 = vmatpush3.bf16.msra.mxu0 %v2097_v9  ;;  %1940 = vmatpush3.bf16.msra.mxu1 %v2098_v10 }
  0x19   : > { %1945 = vmatprep.subr.bf16.mxu0 %v2139_v1  ;;  %1953 = vmatprep.subr.bf16.mxu1 %v2139_v1 }
  0x1b   : > { %1934 = vmatmul.mubr.msk.bf16.vlgmr.msra.gmra.mrb[4].mxu0 %vm387_vm1, %v2239_v8  ;;  %1942 = vmatmul.mubr.msk.bf16.vlgmr.msra.gmra.mrb[4].mxu1 %vm387_vm1, %v2239_v8 }
  0x1c   : > { %1946 = vmatpush3.bf16.msra.mxu0 %v2099_v11  ;;  %1954 = vmatpush3.bf16.msra.mxu1 %v2100_v12 }
  0x1d   : > { %1947 = vmatprep.subr.bf16.mxu0 %v2139_v1  ;;  %1955 = vmatprep.subr.bf16.mxu1 %v2139_v1 }
  0x1e   : > { %1949 = vmatprep.mubr.msk.bf16.mxu0 %vm2140_vm0, %v2139_v1  ;;  %1957 = vmatprep.mubr.msk.bf16.mxu1 %vm2140_vm0, %v2139_v1 }
  0x20   : > { %1948 = vmatpush3.bf16.msra.mxu0 %v2101_v13  ;;  %1956 = vmatpush3.bf16.msra.mxu1 %v2102_v14 }
  0x21   : > { %1961 = vmatprep.subr.bf16.mxu0 %v2139_v1  ;;  %1969 = vmatprep.subr.bf16.mxu1 %v2139_v1 }
  0x23   : > { %1950 = vmatmul.mubr.msk.bf16.vlgmr.msra.gmra.mrb[8].mxu0 %vm387_vm1, %v2239_v8  ;;  %1958 = vmatmul.mubr.msk.bf16.vlgmr.msra.gmra.mrb[8].mxu1 %vm387_vm1, %v2239_v8 }
  0x24   : > { %1962 = vmatpush3.bf16.msra.mxu0 %v2103_v15  ;;  %1970 = vmatpush3.bf16.msra.mxu1 %v2104_v16 }
  0x25   : > { %1963 = vmatprep.subr.bf16.mxu0 %v2139_v1  ;;  %1971 = vmatprep.subr.bf16.mxu1 %v2139_v1 }
  0x26   : > { %1965 = vmatprep.mubr.msk.bf16.mxu0 %vm2140_vm0, %v2139_v1  ;;  %1973 = vmatprep.mubr.msk.bf16.mxu1 %vm2140_vm0, %v2139_v1 }
  0x28   : > { %1964 = vmatpush3.bf16.msra.mxu0 %v2105_v17  ;;  %1972 = vmatpush3.bf16.msra.mxu1 %v2106_v18  ;;  %v1792_v17 = vld [vmem:[%s2498_s2 + $0x2] ss:$0 sm:$0xff]  ;;  %v1793_v18 = vld [vmem:[%s2498_s2 + $0x3] ss:$0 sm:$0xff] }
  0x29   : > { %1977 = vmatprep.subr.bf16.mxu0 %v2139_v1  ;;  %1985 = vmatprep.subr.bf16.mxu1 %v2139_v1 }
  0x2b   : > { %1966 = vmatmul.mubr.msk.bf16.vlgmr.msra.gmra.mrb[12].mxu0 %vm387_vm1, %v2239_v8  ;;  %1974 = vmatmul.mubr.msk.bf16.vlgmr.msra.gmra.mrb[12].mxu1 %vm387_vm1, %v2239_v8 }
  0x2c   : > { %1978 = vmatpush3.bf16.msra.mxu0 %v2107_v19  ;;  %1981 = vmatprep.mubr.msk.bf16.mxu0 %vm2140_vm0, %v2139_v1 }
  0x2d   : > { %1979 = vmatprep.subr.bf16.mxu0 %v2139_v1  ;;  %1989 = vmatprep.mubr.msk.bf16.mxu1 %vm2140_vm0, %v2139_v1 }
  0x2e   : > { %1986 = vmatpush3.bf16.msra.mxu1 %v2108_v20 }
  0x2f   : > { %1987 = vmatprep.subr.bf16.mxu1 %v2139_v1 }
  0x30   : > { %1980 = vmatpush3.bf16.msra.mxu0 %v2109_v21 }
  0x31   : > { %1993 = vmatprep.subr.bf16.mxu0 %v2139_v1 }
  0x32   : > { %1988 = vmatpush3.bf16.msra.mxu1 %v2110_v22 }
  0x33   : > { %1982 = vmatmul.mubr.msk.bf16.vlgmr.msra.gmra.mrb[16].mxu0 %vm387_vm1, %v2239_v8  ;;  %2001 = vmatprep.subr.bf16.mxu1 %v2139_v1 }
  0x34   : > { %1997 = vmatprep.mubr.msk.bf16.mxu0 %vm2140_vm0, %v2139_v1  ;;  %1994 = vmatpush3.bf16.msra.mxu0 %v2111_v23 }
  0x35   : > { %1990 = vmatmul.mubr.msk.bf16.vlgmr.msra.gmra.mrb[16].mxu1 %vm387_vm1, %v2239_v8  ;;  %1995 = vmatprep.subr.bf16.mxu0 %v2139_v1 }
  0x36   : > { %2002 = vmatpush3.bf16.msra.mxu1 %v2112_v24  ;;  %2005 = vmatprep.mubr.msk.bf16.mxu1 %vm2140_vm0, %v2139_v1 }
  0x37   : > { %2003 = vmatprep.subr.bf16.mxu1 %v2139_v1 }
  0x38   : > { %1996 = vmatpush3.bf16.msra.mxu0 %v2113_v25  ;;  %v1822_v25 = vld [vmem:[%s2502_s6] ss:$0 sm:$0xff] }
  0x39   : > { %2009 = vmatprep.subr.bf16.mxu0 %v2139_v1 }
  0x3a   : > { %2004 = vmatpush3.bf16.msra.mxu1 %v2114_v26 }
  0x3b   : > { %2015 = vmatprep.subr.bf16.mxu1 %v2139_v1  ;;  %1998 = vmatmul.mubr.msk.bf16.vlgmr.msra.gmra.mrb[20].mxu0 %vm387_vm1, %v2239_v8 }
  0x3c   : > { %2011 = vmatprep.mubr.msk.bf16.mxu0 %vm2140_vm0, %v2139_v1 }
  0x3d   : > { %2006 = vmatmul.mubr.msk.bf16.vlgmr.msra.gmra.mrb[20].mxu1 %vm387_vm1, %v2239_v8 }
  0x3e   : > { %2017 = vmatprep.mubr.msk.bf16.mxu1 %vm2140_vm0, %v2139_v1 }
  0xe6   : > { %v425_v27 = vpop.f32.mrb[0].mxu0  ;;  %v477_v28 = vpop.f32.mrb[0].mxu1 }
  0xe7   : > { %v1919_v29 = vpop.f32.mrb[1].mxu0  ;;  %v1927_v30 = vpop.f32.mrb[1].mxu1  ;;  %v426_v63 = vadd.f32 %v1790_v57, %v425_v27  ;;  %v478_v0 = vadd.f32 %v1791_v58, %v477_v28  ;;  %v1823_v27 = vld [vmem:[%s2502_s6 + $0x1] ss:$0 sm:$0xff] }
  0xe8   : > { %v428_v31 = vpop.f32.mrb[2].mxu0  ;;  %v480_v32 = vpop.f32.mrb[2].mxu1 }
  0xe9   : > { %v1920_v33 = vpop.f32.mrb[3].mxu0  ;;  %v1928_v34 = vpop.f32.mrb[3].mxu1  ;;  %v1091_v11 = vpack.c.bf16 %v426_v63, %v426_v63  ;;  %v1092_v12 = vpack.c.bf16 %v478_v0, %v478_v0 }
  0xee   : > { %v529_v35 = vpop.f32.mrb[4].mxu0  ;;  %v581_v36 = vpop.f32.mrb[4].mxu1 }
  0xef   : > { %v1935_v37 = vpop.f32.mrb[5].mxu0  ;;  %v1943_v38 = vpop.f32.mrb[5].mxu1  ;;  %v530_v21 = vadd.f32 %v1792_v17, %v529_v35  ;;  %v582_v22 = vadd.f32 %v1793_v18, %v581_v36 }
  0xf0   : > { %v532_v39 = vpop.f32.mrb[6].mxu0  ;;  %v584_v40 = vpop.f32.mrb[6].mxu1 }
  0xf1   : > { %v1936_v41 = vpop.f32.mrb[7].mxu0  ;;  %v1944_v42 = vpop.f32.mrb[7].mxu1  ;;  %v1093_v23 = vpack.c.bf16 %v530_v21, %v530_v21  ;;  %v1094_v24 = vpack.c.bf16 %v582_v22, %v582_v22 }
  0xf6   : > { %v677_v45 = vpop.f32.mrb[8].mxu0  ;;  %v729_v46 = vpop.f32.mrb[8].mxu1 }
  0xf7   : > { %v678_v47 = vadd.f32 %v1806_v43, %v677_v45  ;;  %v730_v48 = vadd.f32 %v1807_v44, %v729_v46  ;;  %v1951_v49 = vpop.f32.mrb[9].mxu0  ;;  %v1959_v50 = vpop.f32.mrb[9].mxu1 }
  0xf8   : > { %v680_v51 = vpop.f32.mrb[10].mxu0  ;;  %v732_v52 = vpop.f32.mrb[10].mxu1 }
  0xf9   : > { %v1095_v53 = vpack.c.bf16 %v678_v47, %v678_v47  ;;  %v1096_v54 = vpack.c.bf16 %v730_v48, %v730_v48  ;;  %v1952_v55 = vpop.f32.mrb[11].mxu0  ;;  %v1960_v56 = vpop.f32.mrb[11].mxu1 }
  0xfb   : > { %v1104_v59 = vsel %vm1099_vm2, %v1095_v53, 0  ;;  %v1150_v60 = vsel %vm1099_vm2, %v1096_v54, 0 }
  0xfc   : > { %2010 = vmatpush3.bf16.xpose.msra.mxu0 %v1104_v59  ;;  %2016 = vmatpush3.bf16.xpose.msra.mxu1 %v1150_v60 }
  0xfd   : > { %2021 = vmatprep.subr.bf16.mxu0 %v2139_v1  ;;  %2027 = vmatprep.subr.bf16.mxu1 %v2139_v1 }
  0xfe   : > { %v781_v2 = vpop.f32.mrb[12].mxu0  ;;  %v833_v3 = vpop.f32.mrb[12].mxu1 }
  0xff   : > { %v782_v4 = vadd.f32 %v1808_v61, %v781_v2  ;;  %v834_v5 = vadd.f32 %v1809_v62, %v833_v3  ;;  %v1967_v6 = vpop.f32.mrb[13].mxu0  ;;  %v1975_v8 = vpop.f32.mrb[13].mxu1 }
 0x100   : > { %v784_v9 = vpop.f32.mrb[14].mxu0  ;;  %v836_v10 = vpop.f32.mrb[14].mxu1 }
 0x101   : > { %v1097_v13 = vpack.c.bf16 %v782_v4, %v782_v4  ;;  %v1098_v14 = vpack.c.bf16 %v834_v5, %v834_v5  ;;  %v1968_v15 = vpop.f32.mrb[15].mxu0  ;;  %v1976_v16 = vpop.f32.mrb[15].mxu1 }
 0x103   : > { %v1196_v19 = vsel %vm1099_vm2, %v1097_v13, 0  ;;  %v1242_v20 = vsel %vm1099_vm2, %v1098_v14, 0  ;;  %2012 = vmatmul.mubr.msk.bf16.vlgmr.msra.gmra.mrb[24].mxu0 %vm1099_vm2, %v1091_v11  ;;  %2018 = vmatmul.mubr.msk.bf16.vlgmr.msra.gmra.mrb[24].mxu1 %vm1099_vm2, %v1092_v12 }
 0x104   : > { %2022 = vmatpush3.bf16.xpose.msra.mxu0 %v1196_v19  ;;  %2028 = vmatpush3.bf16.xpose.msra.mxu1 %v1242_v20 }
 0x105   : > { %2023 = vmatprep.mubr.msk.bf16.mxu0 %vm2140_vm0, %v2139_v1  ;;  %2029 = vmatprep.mubr.msk.bf16.mxu1 %vm2140_vm0, %v2139_v1 }
 0x106   : > { %2033 = vmatprep.subr.bf16.mxu0 %v2139_v1  ;;  %2039 = vmatprep.subr.bf16.mxu1 %v2139_v1  ;;  %v929_v26 = vpop.f32.mrb[16].mxu0 }
 0x107   : > { %v930_v28 = vadd.f32 %v1822_v25, %v929_v26  ;;  %v1983_v29 = vpop.f32.mrb[17].mxu0 }
 0x108   : > { %v932_v30 = vpop.f32.mrb[18].mxu0  ;;  %v981_v31 = vpop.f32.mrb[16].mxu1  ;;  %v1824_v29 = vld [vmem:[%s2502_s6 + $0x2] ss:$0 sm:$0xff] }
 0x109   : > { %v1332_v32 = vpack.c.bf16 %v930_v28, %v930_v28  ;;  %v1984_v33 = vpop.f32.mrb[19].mxu0  ;;  %v982_v34 = vadd.f32 %v1823_v27, %v981_v31  ;;  %v1991_v35 = vpop.f32.mrb[17].mxu1 }
 0x10a   : > { %v984_v36 = vpop.f32.mrb[18].mxu1 }
 0x10b   : > { %2024 = vmatmul.mubr.msk.bf16.vlgmr.msra.gmra.mrb[28].mxu0 %vm1099_vm2, %v1093_v23  ;;  %2030 = vmatmul.mubr.msk.bf16.vlgmr.msra.gmra.mrb[28].mxu1 %vm1099_vm2, %v1094_v24  ;;  %v1341_v37 = vsel %vm1339_vm3, %v1332_v32, 0  ;;  %v1333_v38 = vpack.c.bf16 %v982_v34, %v982_v34  ;;  %v1992_v39 = vpop.f32.mrb[19].mxu1  ;;  %v1825_v32 = vld [vmem:[%s2502_s6 + $0x3] ss:$0 sm:$0xff] }
 0x10c   : > { %2035 = vmatprep.mubr.msk.bf16.mxu0 %vm2140_vm0, %v2139_v1  ;;  %2041 = vmatprep.mubr.msk.bf16.mxu1 %vm2140_vm0, %v2139_v1 }
 0x10d   : > { %2034 = vmatpush3.bf16.msra.mxu0 %v1341_v37  ;;  %v1387_v40 = vsel %vm1339_vm3, %v1333_v38, 0 }
 0x10e   : > { %2045 = vmatprep.subr.bf16.mxu0 %v2139_v1  ;;  %2040 = vmatpush3.bf16.msra.mxu1 %v1387_v40  ;;  %v2417_v41 = vpop.f32.mrb[20].mxu0 }
 0x10f   : > { %2051 = vmatprep.subr.bf16.mxu1 %v2139_v1  ;;  %v1999_v43 = vpop.f32.mrb[21].mxu0  ;;  %v1034_v30 = vadd.f32 %v1824_v29, %v2417_v41 }
 0x110   : > { %v2419_v42 = vpop.f32.mrb[20].mxu1  ;;  %v1036_v45 = vpop.f32.mrb[22].mxu0 }
 0x111   : > { %v2007_v44 = vpop.f32.mrb[21].mxu1  ;;  %v2000_v47 = vpop.f32.mrb[23].mxu0  ;;  %v1334_v34 = vpack.c.bf16 %v1034_v30, %v1034_v30  ;;  %v1086_v35 = vadd.f32 %v1825_v32, %v2419_v42  ;;  %v1525_v42 = vld [vmem:[%s2503_s7] sm:$0xf] }
 0x112   : > { %v1088_v46 = vpop.f32.mrb[22].mxu1  ;;  %v1850_v30 = vld [vmem:[%s2504_s8] ss:$0 sm:$0xff] }
 0x113   : > { %v2008_v48 = vpop.f32.mrb[23].mxu1  ;;  %v1433_v40 = vsel %vm1339_vm3, %v1334_v34, 0  ;;  %v1335_v43 = vpack.c.bf16 %v1086_v35, %v1086_v35  ;;  %v1720_v35 = vadd.f32 %v1850_v30, %v2234_v7 }
 0x115   : > { %v1479_v46 = vsel %vm1339_vm3, %v1335_v43, 0 }
 0x1d6   : > { %v1140_v49 = vpop.f32.mrb[24].mxu0  ;;  %v1186_v50 = vpop.f32.mrb[24].mxu1 }
 0x1d7   : > { %v2013_v51 = vpop.f32.mrb[25].mxu0  ;;  %v2019_v52 = vpop.f32.mrb[25].mxu1  ;;  %v1284_v53 = vsel %vm1099_vm2, %v1140_v49, -inf  ;;  %v1287_v58 = vsel %vm1099_vm2, %v1186_v50, -inf }
 0x1d8   : > { %v1189_v54 = vpop.f32.mrb[26].mxu1  ;;  %1285 = vmax.xlane.f32.xlu0 %v1284_v53  ;;  %v1143_v55 = vpop.f32.mrb[26].mxu0  ;;  %v1526_v53 = vld [vmem:[%s2503_s7 + $0x4] sm:$0xf] }
 0x1d9   : > { %v2014_v56 = vpop.f32.mrb[27].mxu0  ;;  %v2020_v57 = vpop.f32.mrb[27].mxu1  ;;  %v1579_v54 = vsel %vm1339_vm3, %v1526_v53, 0  ;;  %v1527_v55 = vld [vmem:[%s2503_s7 + $0x8] sm:$0xf] }
 0x1dc   : > { %1288 = vmax.xlane.f32.xlu0 %v1287_v58 }
 0x1de   : > { %v1232_v59 = vpop.f32.mrb[28].mxu0  ;;  %v1278_v60 = vpop.f32.mrb[28].mxu1 }
 0x1df   : > { %v2025_v61 = vpop.f32.mrb[29].mxu0  ;;  %v2031_v62 = vpop.f32.mrb[29].mxu1  ;;  %v1290_v63 = vsel %vm1099_vm2, %v1232_v59, -inf  ;;  %v1293_v5 = vsel %vm1099_vm2, %v1278_v60, -inf }
 0x1e0   : > { %v1281_v0 = vpop.f32.mrb[30].mxu1  ;;  %1291 = vmax.xlane.f32.xlu1 %v1290_v63  ;;  %v1235_v2 = vpop.f32.mrb[30].mxu0  ;;  %v1528_v61 = vld [vmem:[%s2503_s7 + $0xc] sm:$0xf] }
 0x1e1   : > { %v2026_v3 = vpop.f32.mrb[31].mxu0  ;;  %v2032_v4 = vpop.f32.mrb[31].mxu1 }
 0x1e2   : > { %v1671_v3 = vsel %vm1339_vm3, %v1528_v61, 0 }
 0x1e4   : > { %1294 = vmax.xlane.f32.xlu1 %v1293_v5 }
 0x265   : > { %v1286_v6 = vpop.xlane.xlu0 %1285 }
 0x266   : > { %v1296_v8 = vsub.f32 %v1140_v49, %v1286_v6  ;;  %v1533_v49 = vsel %vm1339_vm3, %v1525_v42, 0 }
 0x268   : > { %v1300_v9 = vmul.f32 1.442695, %v1296_v8 }
 0x269   : > { %v1289_v10 = vpop.xlane.xlu0 %1288 }
 0x26a   : > { %2115 = vpow2.f32 %v1300_v9  ;;  %v1297_v11 = vsub.f32 %v1186_v50, %v1289_v10 }
 0x26c   : > { %v1302_v12 = vmul.f32 1.442695, %v1297_v11 }
 0x26d   : > { %v1292_v13 = vpop.xlane.xlu1 %1291 }
 0x26e   : > { %2117 = vpow2.f32 %v1302_v12  ;;  %v1298_v14 = vsub.f32 %v1232_v59, %v1292_v13  ;;  %v1625_v59 = vsel %vm1339_vm3, %v1527_v55, 0 }
 0x270   : > { %v1304_v15 = vmul.f32 1.442695, %v1298_v14 }
 0x271   : > { %v1295_v16 = vpop.xlane.xlu1 %1294 }
 0x272   : > { %2119 = vpow2.f32 %v1304_v15  ;;  %v1299_v17 = vsub.f32 %v1278_v60, %v1295_v16 }
 0x274   : > { %v2116_v18 = vpop.eup %2115  ;;  %v1306_v19 = vmul.f32 1.442695, %v1299_v17 }
 0x275   : > { %v1308_v20 = vsel %vm1099_vm2, %v2116_v18, 0.0 }
 0x276   : > { %2121 = vpow2.f32 %v1306_v19  ;;  %1309 = vadd.xlane.f32.xlu0 %v1308_v20 }
 0x278   : > { %v2118_v21 = vpop.eup %2117 }
 0x279   : > { %v1311_v22 = vsel %vm1099_vm2, %v2118_v21, 0.0 }
 0x27a   : > { %1312 = vadd.xlane.f32.xlu1 %v1311_v22 }
 0x27c   : > { %v2120_v23 = vpop.eup %2119 }
 0x27d   : > { %v1314_v24 = vsel %vm1099_vm2, %v2120_v23, 0.0 }
 0x27e   : > { %1315 = vadd.xlane.f32.xlu0 %v1314_v24 }
 0x280   : > { %v2122_v25 = vpop.eup %2121 }
 0x281   : > { %v1317_v26 = vsel %vm1099_vm2, %v2122_v25, 0.0 }
 0x282   : > { %1318 = vadd.xlane.f32.xlu1 %v1317_v26 }
 0x303   : > { %v1310_v27 = vpop.xlane.xlu0 %1309 }
 0x304   : > { %2123 = vrcp.f32 %v1310_v27 }
 0x307   : > { %v1313_v28 = vpop.xlane.xlu1 %1312 }
 0x308   : > { %2125 = vrcp.f32 %v1313_v28 }
 0x30b   : > { %v1316_v31 = vpop.xlane.xlu0 %1315 }
 0x30c   : > { %2127 = vrcp.f32 %v1316_v31 }
 0x30e   : > { %v2124_v33 = vpop.eup %2123 }
 0x30f   : > { %v1324_v36 = vmul.f32 %v2124_v33, %v2116_v18  ;;  %v1319_v37 = vpop.xlane.xlu1 %1318 }
 0x310   : > { %2129 = vrcp.f32 %v1319_v37 }
 0x311   : > { %v1328_v38 = vpack.c.bf16 %v1324_v36, %v1324_v36 }
 0x312   : > { %v2126_v39 = vpop.eup %2125 }
 0x313   : > { %v1325_v44 = vmul.f32 %v2126_v39, %v2118_v21  ;;  %2036 = vmatmul.mubr.msk.bf16.vlgmr.msra.gmra.mrb[32].mxu0 %vm1099_vm2, %v1328_v38 }
 0x314   : > { %2046 = vmatpush3.bf16.msra.mxu0 %v1433_v40  ;;  %2047 = vmatprep.mubr.msk.bf16.mxu0 %vm2140_vm0, %v2139_v1 }
 0x315   : > { %v1329_v41 = vpack.c.bf16 %v1325_v44, %v1325_v44  ;;  %2057 = vmatprep.subr.bf16.mxu0 %v2139_v1 }
 0x316   : > { %v2128_v45 = vpop.eup %2127 }
 0x317   : > { %v1326_v47 = vmul.f32 %v2128_v45, %v2120_v23  ;;  %2042 = vmatmul.mubr.msk.bf16.vlgmr.msra.gmra.mrb[32].mxu1 %vm1099_vm2, %v1329_v41 }
 0x318   : > { %2052 = vmatpush3.bf16.msra.mxu1 %v1479_v46  ;;  %2053 = vmatprep.mubr.msk.bf16.mxu1 %vm2140_vm0, %v2139_v1 }
 0x319   : > { %v1330_v48 = vpack.c.bf16 %v1326_v47, %v1326_v47  ;;  %2063 = vmatprep.subr.bf16.mxu1 %v2139_v1 }
 0x31a   : > { %v2130_v50 = vpop.eup %2129 }
 0x31b   : > { %v1327_v51 = vmul.f32 %v2130_v50, %v2122_v25  ;;  %2048 = vmatmul.mubr.msk.bf16.vlgmr.msra.gmra.mrb[36].mxu0 %vm1099_vm2, %v1330_v48 }
 0x31c   : > { %2058 = vmatpush3.bf16.msra.mxu0 %v1533_v49  ;;  %2059 = vmatprep.mubr.msk.bf16.mxu0 %vm2140_vm0, %v2139_v1 }
 0x31d   : > { %v1331_v52 = vpack.c.bf16 %v1327_v51, %v1327_v51  ;;  %2069 = vmatprep.subr.bf16.mxu0 %v2139_v1 }
 0x31f   : > { %2054 = vmatmul.mubr.msk.bf16.vlgmr.msra.gmra.mrb[36].mxu1 %vm1099_vm2, %v1331_v52 }
 0x320   : > { %2065 = vmatprep.mubr.msk.bf16.mxu1 %vm2140_vm0, %v2139_v1  ;;  %2064 = vmatpush3.bf16.msra.mxu1 %v1579_v54 }
 0x321   : > { %2075 = vmatprep.subr.bf16.mxu1 %v2139_v1 }
 0x3e6   : > { %v1377_v56 = vpop.f32.mrb[32].mxu0 }
 0x3e7   : > { %v1521_v57 = vpack.c.bf16 %v1377_v56, %v1377_v56  ;;  %v2037_v58 = vpop.f32.mrb[33].mxu0 }
 0x3e8   : > { %v1380_v60 = vpop.f32.mrb[34].mxu0 }
 0x3e9   : > { %v2038_v62 = vpop.f32.mrb[35].mxu0  ;;  %2060 = vmatmul.mubr.msk.bf16.vlgmr.msra.gmra.mrb[40].mxu0 %vm1099_vm2, %v1521_v57 }
 0x3ea   : > { %v1423_v63 = vpop.f32.mrb[32].mxu1  ;;  %2070 = vmatpush3.bf16.msra.mxu0 %v1625_v59  ;;  %2071 = vmatprep.mubr.msk.bf16.mxu0 %vm2140_vm0, %v2139_v1 }
 0x3eb   : > { %v1522_v0 = vpack.c.bf16 %v1423_v63, %v1423_v63  ;;  %v2043_v2 = vpop.f32.mrb[33].mxu1 }
 0x3ec   : > { %v1426_v4 = vpop.f32.mrb[34].mxu1 }
 0x3ed   : > { %v2044_v5 = vpop.f32.mrb[35].mxu1  ;;  %2066 = vmatmul.mubr.msk.bf16.vlgmr.msra.gmra.mrb[40].mxu1 %vm1099_vm2, %v1522_v0 }
 0x3ee   : > { %v1469_v6 = vpop.f32.mrb[36].mxu0  ;;  %2076 = vmatpush3.bf16.msra.mxu1 %v1671_v3  ;;  %2077 = vmatprep.mubr.msk.bf16.mxu1 %vm2140_vm0, %v2139_v1 }
 0x3ef   : > { %v1523_v8 = vpack.c.bf16 %v1469_v6, %v1469_v6  ;;  %v2049_v9 = vpop.f32.mrb[37].mxu0 }
 0x3f0   : > { %v1472_v10 = vpop.f32.mrb[38].mxu0 }
 0x3f1   : > { %v2050_v11 = vpop.f32.mrb[39].mxu0  ;;  %2072 = vmatmul.mubr.msk.bf16.vlgmr.msra.gmra.mrb[44].mxu0 %vm1099_vm2, %v1523_v8 }
 0x3f2   : > { %v1515_v12 = vpop.f32.mrb[36].mxu1 }
 0x3f3   : > { %v1524_v13 = vpack.c.bf16 %v1515_v12, %v1515_v12  ;;  %v2055_v14 = vpop.f32.mrb[37].mxu1 }
 0x3f4   : > { %v1518_v15 = vpop.f32.mrb[38].mxu1 }
 0x3f5   : > { %v2056_v16 = vpop.f32.mrb[39].mxu1  ;;  %2078 = vmatmul.mubr.msk.bf16.vlgmr.msra.gmra.mrb[44].mxu1 %vm1099_vm2, %v1524_v13 }
 0x4bc   : > { %v1569_v17 = vpop.f32.mrb[40].mxu0 }
 0x4bd   : > { %v2061_v18 = vpop.f32.mrb[41].mxu0  ;;  %v1721_v1 = vsel %vm387_vm1, %v1569_v17, 0.0 }
 0x4be   : > { %v1572_v19 = vpop.f32.mrb[42].mxu0 }
 0x4bf   : > { %v2062_v20 = vpop.f32.mrb[43].mxu0 }
 0x4c0   : > { %v1615_v21 = vpop.f32.mrb[40].mxu1 }
 0x4c1   : > { %v1722_v22 = vsel %vm387_vm1, %v1615_v21, 0.0  ;;  %v2067_v23 = vpop.f32.mrb[41].mxu1 }
 0x4c2   : > { %v1723_v24 = vadd.f32 %v1722_v22, %v1721_v1  ;;  %v1618_v25 = vpop.f32.mrb[42].mxu1 }
 0x4c3   : > { %v2068_v26 = vpop.f32.mrb[43].mxu1 }
 0x4c4   : > { %v1661_v27 = vpop.f32.mrb[44].mxu0 }
 0x4c5   : > { %v1724_v28 = vsel %vm387_vm1, %v1661_v27, 0.0  ;;  %v2073_v29 = vpop.f32.mrb[45].mxu0 }
 0x4c6   : > { %v1725_v31 = vadd.f32 %v1724_v28, %v1723_v24  ;;  %v1664_v32 = vpop.f32.mrb[46].mxu0 }
 0x4c7   : > { %v2074_v33 = vpop.f32.mrb[47].mxu0 }
 0x4c8   : > { %v1707_v34 = vpop.f32.mrb[44].mxu1 }
 0x4c9   : > { %v1726_v36 = vsel %vm387_vm1, %v1707_v34, 0.0  ;;  %v2079_v37 = vpop.f32.mrb[45].mxu1 }
 0x4ca   : > { %v1727_v38 = vadd.f32 %v1726_v36, %v1725_v31  ;;  %v1710_v39 = vpop.f32.mrb[46].mxu1 }
 0x4cb   : > { %v2080_v40 = vpop.f32.mrb[47].mxu1 }
 0x4cc   : > { %v1728_v43 = vadd.f32 %v1727_v38, %v1720_v35 }
 0x4ce   : > { %1729 = vst.msk [vmem:[%s327_s27] sm:$0xff] %vm387_vm1, %v1728_v43 }
 0x4cf PF: > { %s19_s30 = sadd.s32 1, %s2137_s30  }
 0x4d0   : > { %p16_p4 = scmp.ge.s32.totalorder %s19_s30, 4  }
 0x4d2   :  { %18 = sbr.rel (!%p16_p4) target bundleno = 1 (0x1), region = 86 }

</bundles_post_ra>
